<compile_context>
chip_gen: v5e
topology: v5e:2x2
jax: 0.10.0
libtpu: 0.0.40
codegen_flags: <defaults>
</compile_context>

<pallas_src>
import jax
import jax.numpy as jnp
from jax.experimental import pallas as pl
from jax.experimental.pallas import tpu as pltpu  # noqa: F401  (TPU backend import)


def multitask_loss_kernel(in_ref, out_ref):
    # in_ref : (1, 4) f32  = [lv0, lv1, mlcc_loss, mcc_loss] along lanes
    # out_ref: (1, 3) f32  = [loss, w_mlcc, w_mcc] along lanes
    v = in_ref[...]
    lv0 = v[:, 0:1]
    lv1 = v[:, 1:2]
    ml = v[:, 2:3]
    mc = v[:, 3:4]

    # 1 / (2 * lv**2) * x  ==  x / (2 * lv * lv)
    w_mlcc = ml / (2.0 * lv0 * lv0)
    w_mcc = mc / (2.0 * lv1 * lv1)
    loss = w_mlcc + w_mcc + jnp.log(lv0 * lv1)

    out_ref[:, 0:1] = loss
    out_ref[:, 1:2] = w_mlcc
    out_ref[:, 2:3] = w_mcc


def multitask_loss(log_vars, mlcc_loss, mcc_loss):
    """Pallas implementation of MultiTaskLossWrapper.forward (task_num == 2)."""
    f32 = jnp.float32
    # Single packed (1, 4) lane-major input: [lv0, lv1, mlcc, mcc].
    packed = jnp.concatenate(
        [
            jnp.reshape(log_vars.astype(f32), (1, 2)),
            jnp.reshape(jnp.asarray(mlcc_loss, f32), (1, 1)),
            jnp.reshape(jnp.asarray(mcc_loss, f32), (1, 1)),
        ],
        axis=1,
    )

    out = pl.pallas_call(
        multitask_loss_kernel,
        out_shape=jax.ShapeDtypeStruct((1, 3), f32),
        in_specs=[pl.BlockSpec((1, 4), lambda: (0, 0))],
        out_specs=pl.BlockSpec((1, 3), lambda: (0, 0)),
    )(packed)

    # Single packed output; slice the three scalars once.
    return out[0, 0], out[0, 1], out[0, 2]


def multitask_loss_ref(log_vars, mlcc_loss, mcc_loss):
    """Pure-JAX reference matching the PyTorch module."""
    w_mlcc = 1.0 / (2.0 * log_vars[0] ** 2) * mlcc_loss
    w_mcc = 1.0 / (2.0 * log_vars[1] ** 2) * mcc_loss
    loss = w_mlcc + w_mcc + jnp.log(log_vars[0] * log_vars[1])
    return loss, w_mlcc, w_mcc


if __name__ == "__main__":
    key = jax.random.PRNGKey(0)
    k_lv, k_ml, k_mc = jax.random.split(key, 3)

    task_num = 2
    # The module initializes log_vars = ones(task_num); perturb deterministically
    # (kept positive) so log() / the scaling are actually exercised.
    log_vars = jax.random.uniform(k_lv, (task_num,), jnp.float32,
                                  minval=0.5, maxval=1.5)
    mlcc_loss = jax.random.uniform(k_ml, (), jnp.float32, minval=0.1, maxval=2.0)
    mcc_loss = jax.random.uniform(k_mc, (), jnp.float32, minval=0.1, maxval=2.0)

    out = multitask_loss(log_vars, mlcc_loss, mcc_loss)
    out = jax.block_until_ready(out)
    ref = jax.block_until_ready(multitask_loss_ref(log_vars, mlcc_loss, mcc_loss))

    for got, want in zip(out, ref):
        assert jnp.allclose(got, want, atol=1e-6, rtol=1e-6), (got, want)
    print("KERNEL_OK")
</pallas_src>

<mosaic_0001>
module attributes {stable_mosaic.version = 11 : i64} {
  func.func @multitask_loss_kernel(%arg0: memref<1x4xf32, #tpu.memory_space<vmem>>, %arg1: memref<1x3xf32, #tpu.memory_space<vmem>>) attributes {dimension_semantics = [], scalar_prefetch = 0 : i64, scratch_operands = 0 : i64, tpu.core_type = #tpu.core_type<tc>} {
    %c0 = arith.constant 0 : index
    %c0_0 = arith.constant 0 : index
    %0 = vector.load %arg0[%c0, %c0_0] : memref<1x4xf32, #tpu.memory_space<vmem>>, vector<1x4xf32>
    %1 = vector.extract_strided_slice %0 {offsets = [0, 0], sizes = [1, 1], strides = [1, 1]} : vector<1x4xf32> to vector<1x1xf32>
    %2 = vector.extract_strided_slice %0 {offsets = [0, 1], sizes = [1, 1], strides = [1, 1]} : vector<1x4xf32> to vector<1x1xf32>
    %3 = vector.extract_strided_slice %0 {offsets = [0, 2], sizes = [1, 1], strides = [1, 1]} : vector<1x4xf32> to vector<1x1xf32>
    %4 = vector.extract_strided_slice %0 {offsets = [0, 3], sizes = [1, 1], strides = [1, 1]} : vector<1x4xf32> to vector<1x1xf32>
    %cst = arith.constant 2.000000e+00 : f32
    %5 = vector.broadcast %cst : f32 to vector<1x1xf32>
    %6 = arith.mulf %5, %1 : vector<1x1xf32>
    %7 = arith.mulf %6, %1 : vector<1x1xf32>
    %8 = arith.divf %3, %7 : vector<1x1xf32>
    %cst_1 = arith.constant 2.000000e+00 : f32
    %9 = vector.broadcast %cst_1 : f32 to vector<1x1xf32>
    %10 = arith.mulf %9, %2 : vector<1x1xf32>
    %11 = arith.mulf %10, %2 : vector<1x1xf32>
    %12 = arith.divf %4, %11 : vector<1x1xf32>
    %13 = arith.addf %8, %12 : vector<1x1xf32>
    %14 = arith.mulf %1, %2 : vector<1x1xf32>
    %15 = math.log %14 : vector<1x1xf32>
    %16 = arith.addf %13, %15 : vector<1x1xf32>
    %c0_2 = arith.constant 0 : index
    %c0_3 = arith.constant 0 : index
    %17 = vector.load %arg1[%c0_2, %c0_3] : memref<1x3xf32, #tpu.memory_space<vmem>>, vector<1x1xf32>
    tpu.vector_store %arg1[%c0_2, %c0_3], %16 {strides = array<i32>} : memref<1x3xf32, #tpu.memory_space<vmem>>, vector<1x1xf32>,
    %c0_4 = arith.constant 0 : index
    %c1 = arith.constant 1 : index
    %18 = vector.load %arg1[%c0_4, %c1] : memref<1x3xf32, #tpu.memory_space<vmem>>, vector<1x1xf32>
    tpu.vector_store %arg1[%c0_4, %c1], %8 {strides = array<i32>} : memref<1x3xf32, #tpu.memory_space<vmem>>, vector<1x1xf32>,
    %c0_5 = arith.constant 0 : index
    %c2 = arith.constant 2 : index
    %19 = vector.load %arg1[%c0_5, %c2] : memref<1x3xf32, #tpu.memory_space<vmem>>, vector<1x1xf32>
    tpu.vector_store %arg1[%c0_5, %c2], %12 {strides = array<i32>} : memref<1x3xf32, #tpu.memory_space<vmem>>, vector<1x1xf32>,
    return
  }
}

</mosaic_0001>

<bundles_post_ra>
// kernel: tpu_custom_call.1
= control target key start
LH: loop header
LB: loop body
LE: loop exit
PB: predicated region body
PF: predicated region fallthrough
CT: control target
= control target key end

     0   :  { %6 = vsyncpa [#allocation3], 0  ;;  %s179_s0 = inlined_call_operand.hbm [shape: f32[1,4], index: 0, kind: input, shape index: {}]   ;;  %s180_s1 = inlined_call_operand.hbm [shape: f32[1,3], index: 1, kind: output, shape index: {}]  }
   0x1   :  { %7 = vsyncpa [#allocation4], 0  ;;  %s13_s8 = sshll.u32 %s179_s0, 4  ;;  %s155_s9 = smov [#allocation2]   ;;  %s14_s8 = int_to_ptr.hbm [resolvable:$true] %s13_s8 }
   0x2   :  { %s15_s10 = sshll.u32 %s155_s9, 4  ;;  %s16_s10 = int_to_ptr.vmem [resolvable:$true] %s15_s10 }
   0x3   :  { %18 = dma.hbm_to_vmem [thread:$0]  %s14_s8, 16, %s16_s10, [#allocation3]  }
   0x4   :  { %151 = dma.done.wait [#allocation3], 16  }
   0x5   :  { %152 = vsyncadd [#allocation3], 4294967280  ;;  %v23_v0 = vld [vmem:[#allocation2] sm:$0x1]  ;;  %s156_s11 = smov 2   ;;  %s157_s12 = smov 127  }
   0x6   :  { %v24_v1 = vmul.f32 2.0, %v23_v0  ;;  %s158_s0 = smov 126   ;;  %vm67_vm4 = vcmask 0   ;;  %s159_s13 = smov [#allocation5]   ;;  %vm73_vm5 = vcmask 8200   ;;  %vm75_vm6 = vcmask 16400  }
   0x7   :  { %s82_s14 = sshll.u32 %s159_s13, 4  ;;  %s84_s17 = sshll.u32 %s180_s1, 4  ;;  %s83_s14 = int_to_ptr.vmem [resolvable:$true] %s82_s14  ;;  %s85_s17 = int_to_ptr.hbm [resolvable:$true] %s84_s17 }
   0x8   :  { %v25_v2 = vmul.f32 %v24_v1, %v23_v0 }
   0xa   :  { %27 = vrot.lane.b32.xlu0 %v25_v2, %s156_s11 }
  0x12   :  { %51 = vrot.lane.b32.xlu0 %v23_v0, %s157_s12 }
  0x7c   :  { %v28_v3 = vpop.permute.xlu0 %27 }
  0x7d   :  { %99 = vrcp.f32 %v28_v3  ;;  %v41_v8 = vand.u32 2147483648, %v28_v3  ;;  %v39_v11 = vand.u32 2147483647, %v28_v3  ;;  %vm35_vm1 = vweird.f32 %v28_v3 }
  0x7f   :  { %v42_v13 = vor.u32 1.1754944e-38, %v41_v8  ;;  %vm40_vm3 = vcmp.eq.f32.partialorder %v39_v11, 8.507059e+37 }
  0x83   :  { %v100_v4 = vpop.eup %99 }
  0x84   :  { %v31_v5 = vmul.f32 %v100_v4, %v28_v3  ;;  %v52_v6 = vpop.permute.xlu0 %51  ;;  %vm36_vm0 = vweird.f32 %v100_v4 }
  0x85   :  { %v54_v9 = vmul.f32 %v52_v6, %v23_v0  ;;  %vm37_vm2 = vmor %vm35_vm1, %vm36_vm0 }
  0x86   :  { %v32_v7 = vsub.f32 1.0, %v31_v5 }
  0x87   :  { %101 = vlog2.f32 %v54_v9 }
  0x88   :  { %v33_v10 = vmul.f32 %v100_v4, %v32_v7 }
  0x8a   :  { %v34_v12 = vadd.f32 %v100_v4, %v33_v10 }
  0x8c   :  { %v38_v14 = vsel %vm37_vm2, %v100_v4, %v34_v12 }
  0x8d   :  { %v43_v15 = vsel %vm40_vm3, %v42_v13, %v38_v14  ;;  %v102_v17 = vpop.eup %101 }
  0x8e   :  { %v44_v16 = vmul.f32 %v43_v15, %v23_v0  ;;  %v56_v18 = vmul.f32 0.6931472, %v102_v17 }
  0x90   :  { %46 = vrot.lane.b32.xlu1 %v44_v16, %s157_s12  ;;  %v69_v24 = vperm.slane %v44_v16, 0 }
  0x98   :  { %58 = vrot.lane.b32.xlu1 %v56_v18, %s156_s11 }
 0x102   :  { %v47_v19 = vpop.permute.xlu1 %46 }
 0x103   :  { %v49_v20 = vadd.f32 %v47_v19, %v44_v16 }
 0x10a   :  { %v59_v21 = vpop.permute.xlu1 %58 }
 0x10b   :  { %v61_v22 = vadd.f32 %v59_v21, %v49_v20 }
 0x10d   :  { %v63_v23 = vperm.slane %v61_v22, 0 }
 0x10f   :  { %64 = vrot.lane.b32.xlu2 %v63_v23, %s158_s0 }
 0x117   :  { %70 = vrot.lane.b32.xlu2 %v69_v24, %s157_s12 }
 0x169   :  { %v65_v25 = vpop.permute.xlu2 %64 }
 0x16a   :  { %68 = vst.msk [vmem:[#allocation5] sm:$0x1] %vm67_vm4, %v65_v25 }
 0x171   :  { %v71_v26 = vpop.permute.xlu2 %70 }
 0x172   :  { %74 = vst.msk [vmem:[#allocation5] sm:$0x1] %vm73_vm5, %v71_v26 }
 0x173   :  { %76 = vst.msk [vmem:[#allocation5] sm:$0x1] %vm75_vm6, %v71_v26 }
 0x174   :  { %87 = dma.vmem_to_hbm [thread:$0]  %s83_s14, 16, %s85_s17, [#allocation4]  }
 0x175   :  { %153 = dma.done.wait [#allocation4], 16  }
 0x176   :  { %154 = vsyncadd [#allocation4], 4294967280 }
 0x177   :  { %92 = vsyncpa [#allocation3], 1 }
 0x178   :  { %93 = vsyncpa [#allocation4], 1 }

</bundles_post_ra>
